<compile_context>
chip_gen: v7x
topology: tpu7x:2x2x1
jax: 0.10.0
libtpu: 0.0.40
codegen_flags: <defaults>
</compile_context>

<pallas_src>
import jax
import jax.numpy as jnp
from jax import lax
from jax.experimental import pallas as pl
from jax.experimental.pallas import tpu as pltpu


# ----------------------------------------------------------------------------
# Fast path: VMEM-resident tables, one-hot MXU gather.
# ----------------------------------------------------------------------------
def _cplr_vmem_kernel(users_ref, pos_ref, neg_ref, uembT_ref, iembT_ref, out_ref):
    n_users = uembT_ref.shape[1]
    n_items = iembT_ref.shape[1]
    tile_b = out_ref.shape[1]

    u = users_ref[...]                                    # (1, tile_b) int32
    p = pos_ref[...]
    n = neg_ref[...]

    # One-hot selection matrices with the batch on the lane axis.
    u_iota = lax.broadcasted_iota(jnp.int32, (n_users, tile_b), 0)
    i_iota = lax.broadcasted_iota(jnp.int32, (n_items, tile_b), 0)
    oh_u = (u_iota == u).astype(jnp.float32)                               # (n_users, tile_b)
    oh_d = ((i_iota == p).astype(jnp.float32)
            - (i_iota == n).astype(jnp.float32))                           # (n_items, tile_b)

    # Gather-by-matmul on the MXU (tables are (F+1, n_*) and stay resident).
    ue_t = jnp.dot(uembT_ref[...].astype(jnp.float32), oh_u,
                   preferred_element_type=jnp.float32)                     # (F+1, tile_b)
    di_t = jnp.dot(iembT_ref[...].astype(jnp.float32), oh_d,
                   preferred_element_type=jnp.float32)                     # (F+1, tile_b)

    # Single reduction over the (augmented) factor axis -> lane-dense output.
    out_ref[...] = jnp.sum(ue_t * di_t, axis=0, keepdims=True)


def _cplr_forward_vmem(user_emb, item_emb, item_bias, users, pos, neg, tile_b):
    n_users, F = user_emb.shape
    n_items = item_emb.shape[0]
    B = users.shape[0]
    tdt = user_emb.dtype

    # Fold the biases into the tables:
    #   user rows get a ones column, item rows get item_bias as a column, so
    #   score_diff = <uemb_aug[u], iemb_aug[pos] - iemb_aug[neg]>.
    uembT = jnp.concatenate(
        [user_emb.T, jnp.ones((1, n_users), tdt)], axis=0)                 # (F+1, n_users)
    iembT = jnp.concatenate(
        [item_emb.T, item_bias.reshape(1, n_items).astype(tdt)], axis=0)   # (F+1, n_items)

    users2 = users.reshape(1, B)
    pos2 = pos.reshape(1, B)
    neg2 = neg.reshape(1, B)

    out = pl.pallas_call(
        _cplr_vmem_kernel,
        out_shape=jax.ShapeDtypeStruct((1, B), jnp.float32),
        grid_spec=pl.GridSpec(
            grid=(B // tile_b,),
            in_specs=[
                pl.BlockSpec((1, tile_b), lambda i: (0, i)),       # users
                pl.BlockSpec((1, tile_b), lambda i: (0, i)),       # pos items
                pl.BlockSpec((1, tile_b), lambda i: (0, i)),       # neg items
                pl.BlockSpec((F + 1, n_users), lambda i: (0, 0)),  # user table (resident)
                pl.BlockSpec((F + 1, n_items), lambda i: (0, 0)),  # item table (resident)
            ],
            out_specs=pl.BlockSpec((1, tile_b), lambda i: (0, i)),
        ),
        compiler_params=pltpu.CompilerParams(
            dimension_semantics=("parallel",),      # shard tiles across TCs (v7x)
            vmem_limit_bytes=32 * 1024 * 1024,      # far above actual use, fits all gens
        ),
    )(users2, pos2, neg2, uembT, iembT)
    return out[0]


# ----------------------------------------------------------------------------
# Fallback path: tables stay in HBM, fused per-row DMA gather into VMEM.
# ----------------------------------------------------------------------------
_DMA_ISSUE_UNROLL = 8


def _cplr_dma_kernel(users_sref, pos_sref, neg_sref,       # scalar prefetch (SMEM)
                     uemb_hbm, iemb_hbm, bias_ref,         # inputs
                     out_ref,                              # output block (1, tile_b) f32
                     ue_buf, uip_buf, uin_buf, sem):       # scratch
    tile_b = ue_buf.shape[0]
    base = pl.program_id(0) * tile_b

    unroll = _DMA_ISSUE_UNROLL if tile_b % _DMA_ISSUE_UNROLL == 0 else 1

    # Issue one table-row DMA per sample per stream; partially unrolled so the
    # descriptor pushes (vector-misc slot) and SMEM index loads co-issue.
    @pl.loop(0, tile_b // unroll)
    def _issue(c):
        r0 = c * unroll
        for k in range(unroll):       # static Python unroll
            r = r0 + k
            row = base + r
            pltpu.make_async_copy(uemb_hbm.at[users_sref[row]], ue_buf.at[r], sem.at[0]).start()
            pltpu.make_async_copy(iemb_hbm.at[pos_sref[row]], uip_buf.at[r], sem.at[1]).start()
            pltpu.make_async_copy(iemb_hbm.at[neg_sref[row]], uin_buf.at[r], sem.at[2]).start()

    # One bulk wait per stream: DMA semaphores count bytes, and the tile_b
    # row copies sum to exactly one full-buffer copy.  Using the buffer as
    # both src and dst gives a descriptor with the right byte count without
    # depending on the HBM table shapes (fixes the earlier uemb/iemb mixup).
    pltpu.make_async_copy(ue_buf, ue_buf, sem.at[0]).wait()
    pltpu.make_async_copy(uip_buf, uip_buf, sem.at[1]).wait()
    pltpu.make_async_copy(uin_buf, uin_buf, sem.at[2]).wait()

    # user_bias cancels; single reduction over the factor axis.
    ue = ue_buf[...].astype(jnp.float32)
    diff = uip_buf[...].astype(jnp.float32) - uin_buf[...].astype(jnp.float32)
    scores = jnp.sum(ue * diff, axis=-1)                       # (tile_b,)
    out_ref[...] = bias_ref[...] + scores[None, :]


def _cplr_forward_dma(user_emb, item_emb, item_bias, users, pos, neg, tile_b):
    B = users.shape[0]
    F = user_emb.shape[1]

    # Item-bias difference is O(B) bytes; the XLA glue gather is negligible
    # next to the (B, F) embedding rows and keeps item_bias out of VMEM.
    bias_diff = (item_bias[pos, 0] - item_bias[neg, 0]).reshape(1, B).astype(jnp.float32)

    out = pl.pallas_call(
        _cplr_dma_kernel,
        out_shape=jax.ShapeDtypeStruct((1, B), jnp.float32),
        grid_spec=pltpu.PrefetchScalarGridSpec(
            num_scalar_prefetch=3,                         # users, pos, neg -> SMEM
            grid=(B // tile_b,),
            in_specs=[
                pl.BlockSpec(memory_space=pl.ANY),         # user_embeddings table (HBM)
                pl.BlockSpec(memory_space=pl.ANY),         # item_embeddings table (HBM)
                pl.BlockSpec((1, tile_b), lambda i, u, p, n: (0, i)),   # bias diff
            ],
            out_specs=pl.BlockSpec((1, tile_b), lambda i, u, p, n: (0, i)),
            scratch_shapes=[
                pltpu.VMEM((tile_b, F), user_emb.dtype),   # gathered user rows
                pltpu.VMEM((tile_b, F), item_emb.dtype),   # gathered pos-item rows
                pltpu.VMEM((tile_b, F), item_emb.dtype),   # gathered neg-item rows
                pltpu.SemaphoreType.DMA((3,)),
            ],
        ),
        compiler_params=pltpu.CompilerParams(
            dimension_semantics=("parallel",),             # each step self-contained
            vmem_limit_bytes=32 * 1024 * 1024,
        ),
    )(users, pos, neg, user_emb, item_emb, bias_diff)
    return out[0]


# ----------------------------------------------------------------------------
# Public wrapper.
# ----------------------------------------------------------------------------
def _pick_tile_b(B, max_tile=1024):
    """Largest 128-multiple tile dividing B (cap max_tile); prefers >=2 grid
    steps when B allows it so both v7x TensorCores get work."""
    if B % 128 != 0:
        return B                                   # ragged batch: single full tile
    cap = B
    if B >= 256 and (B // 2) % 128 == 0:
        cap = B // 2
    cap = min(cap, max_tile)
    t = max((cap // 128) * 128, 128)
    while B % t:
        t -= 128
    return t


def cplr_forward(params, users, pos_items, neg_items, *, tile_b=None, gather_mode="auto"):
    """Pallas implementation of CPLR.forward(users, (pos_items, neg_items))."""
    user_emb = params["user_embeddings"]     # (n_users, F)
    item_emb = params["item_embeddings"]     # (n_items, F)
    item_bias = params["item_biases"]        # (n_items, 1)
    # params["user_biases"] cancels exactly in the pairwise difference.

    n_users, F = user_emb.shape
    n_items = item_emb.shape[0]
    B = users.shape[0]

    if tile_b is None:
        tile_b = _pick_tile_b(B)
    assert B % tile_b == 0, "batch must be divisible by tile_b"
    assert tile_b == B or tile_b % 128 == 0, \
        "tile_b must be the full batch or a multiple of 128 (lane-dense blocks)"

    users = users.astype(jnp.int32)
    pos_items = pos_items.astype(jnp.int32)
    neg_items = neg_items.astype(jnp.int32)

    if gather_mode == "auto":
        # Fast path only when the one-hot tiles + (double-buffered) tables are
        # small; budgeted against v7x's 64 MiB VMEM, not v5e/v6e's 128 MiB.
        onehot_bytes = (n_users + 2 * n_items) * tile_b * 4
        table_bytes = 2 * (F + 1) * (n_users + n_items) * user_emb.dtype.itemsize
        gather_mode = "vmem" if (onehot_bytes + table_bytes) <= 16 * 1024 * 1024 else "dma"

    if gather_mode == "vmem":
        return _cplr_forward_vmem(user_emb, item_emb, item_bias,
                                  users, pos_items, neg_items, tile_b)
    return _cplr_forward_dma(user_emb, item_emb, item_bias,
                             users, pos_items, neg_items, tile_b)


def reference_forward(params, users, pos_items, neg_items):
    def predict(u, it):
        ues = params["user_embeddings"][u]
        uis = params["item_embeddings"][it]
        preds = params["user_biases"][u] + params["item_biases"][it]
        preds = preds + jnp.sum(ues * uis, axis=-1, keepdims=True)
        return preds[:, 0]
    return predict(users, pos_items) - predict(users, neg_items)


if __name__ == "__main__":
    key = jax.random.PRNGKey(0)
    n_users, n_items, n_factors, batch = 64, 96, 32, 256

    k1, k2, k3, k4, k5, k6, k7 = jax.random.split(key, 7)
    # nn.Embedding default init is N(0, 1); deterministic synthetic params.
    params = {
        "user_biases": jax.random.normal(k1, (n_users, 1), jnp.float32),
        "item_biases": jax.random.normal(k2, (n_items, 1), jnp.float32),
        "user_embeddings": jax.random.normal(k3, (n_users, n_factors), jnp.float32),
        "item_embeddings": jax.random.normal(k4, (n_items, n_factors), jnp.float32),
    }

    users = jax.random.randint(k5, (batch,), 0, n_users, jnp.int32)
    pos_items = jax.random.randint(k6, (batch,), 0, n_items, jnp.int32)
    neg_items = jax.random.randint(k7, (batch,), 0, n_items, jnp.int32)

    ref = reference_forward(params, users, pos_items, neg_items)

    # Fast path: VMEM-resident tables + one-hot MXU gather, 2-step grid.
    fwd_vmem = jax.jit(lambda p, u, pi, ni: cplr_forward(p, u, pi, ni,
                                                         tile_b=128, gather_mode="vmem"))
    out_vmem = jax.block_until_ready(fwd_vmem(params, users, pos_items, neg_items))
    assert out_vmem.shape == (batch,)
    assert jnp.allclose(out_vmem, ref, atol=1e-4, rtol=1e-4), (out_vmem, ref)

    # Fallback path: HBM tables + fused per-row DMA gather (bulk waits).
    fwd_dma = jax.jit(lambda p, u, pi, ni: cplr_forward(p, u, pi, ni,
                                                        tile_b=128, gather_mode="dma"))
    out_dma = jax.block_until_ready(fwd_dma(params, users, pos_items, neg_items))
    assert jnp.allclose(out_dma, ref, atol=1e-4, rtol=1e-4), (out_dma, ref)

    # Auto heuristic (picks the VMEM path at these sizes, default tile_b).
    fwd_auto = jax.jit(lambda p, u, pi, ni: cplr_forward(p, u, pi, ni))
    out_auto = jax.block_until_ready(fwd_auto(params, users, pos_items, neg_items))
    assert jnp.allclose(out_auto, ref, atol=1e-4, rtol=1e-4), (out_auto, ref)

    print("KERNEL_OK")
</pallas_src>

<mosaic_0001>
module attributes {stable_mosaic.version = 11 : i64} {
  func.func @_cplr_vmem_kernel(%arg0: i32, %arg1: memref<1x128xi32, #tpu.memory_space<vmem>>, %arg2: memref<1x128xi32, #tpu.memory_space<vmem>>, %arg3: memref<1x128xi32, #tpu.memory_space<vmem>>, %arg4: memref<33x64xf32, #tpu.memory_space<vmem>>, %arg5: memref<33x96xf32, #tpu.memory_space<vmem>>, %arg6: memref<1x128xf32, #tpu.memory_space<vmem>>) attributes {dimension_semantics = [#tpu.dimension_semantics<parallel>], iteration_bounds = array<i64: 2>, scalar_prefetch = 0 : i64, scratch_operands = 0 : i64, tpu.core_type = #tpu.core_type<tc>, window_params = [{transform_indices = @transform_0, window_bounds = array<i64: 1, 128>}, {transform_indices = @transform_1, window_bounds = array<i64: 1, 128>}, {transform_indices = @transform_2, window_bounds = array<i64: 1, 128>}, {pipeline_mode = #tpu.pipeline_mode<synchronous>, transform_indices = @transform_3, window_bounds = array<i64: 33, 64>}, {pipeline_mode = #tpu.pipeline_mode<synchronous>, transform_indices = @transform_4, window_bounds = array<i64: 33, 96>}, {transform_indices = @transform_5, window_bounds = array<i64: 1, 128>}]} {
    %c0 = arith.constant 0 : index
    %c0_0 = arith.constant 0 : index
    %0 = vector.load %arg1[%c0, %c0_0] : memref<1x128xi32, #tpu.memory_space<vmem>>, vector<1x128xi32>
    %c0_1 = arith.constant 0 : index
    %c0_2 = arith.constant 0 : index
    %1 = vector.load %arg2[%c0_1, %c0_2] : memref<1x128xi32, #tpu.memory_space<vmem>>, vector<1x128xi32>
    %c0_3 = arith.constant 0 : index
    %c0_4 = arith.constant 0 : index
    %2 = vector.load %arg3[%c0_3, %c0_4] : memref<1x128xi32, #tpu.memory_space<vmem>>, vector<1x128xi32>
    %3 = tpu.iota {dimensions = array<i32: 0>} : vector<64x128xi32>
    %4 = tpu.iota {dimensions = array<i32: 0>} : vector<96x128xi32>
    %5 = vector.broadcast %0 : vector<1x128xi32> to vector<64x128xi32>
    %6 = arith.cmpi eq, %3, %5 : vector<64x128xi32>
    %7 = arith.extui %6 : vector<64x128xi1> to vector<64x128xi32>
    %8 = arith.sitofp %7 : vector<64x128xi32> to vector<64x128xf32>
    %9 = vector.broadcast %1 : vector<1x128xi32> to vector<96x128xi32>
    %10 = arith.cmpi eq, %4, %9 : vector<96x128xi32>
    %11 = arith.extui %10 : vector<96x128xi1> to vector<96x128xi32>
    %12 = arith.sitofp %11 : vector<96x128xi32> to vector<96x128xf32>
    %13 = vector.broadcast %2 : vector<1x128xi32> to vector<96x128xi32>
    %14 = arith.cmpi eq, %4, %13 : vector<96x128xi32>
    %15 = arith.extui %14 : vector<96x128xi1> to vector<96x128xi32>
    %16 = arith.sitofp %15 : vector<96x128xi32> to vector<96x128xf32>
    %17 = arith.subf %12, %16 : vector<96x128xf32>
    %c0_5 = arith.constant 0 : index
    %c0_6 = arith.constant 0 : index
    %18 = vector.load %arg4[%c0_5, %c0_6] : memref<33x64xf32, #tpu.memory_space<vmem>>, vector<33x64xf32>
    %cst = arith.constant dense<0.000000e+00> : vector<33x128xf32>
    %19 = tpu.matmul %18, %8, %cst {dimension_numbers = #tpu.dot_dimension_numbers<[1], [0], [0], [1], [0, 0, 1, 1], [], []>} : vector<33x64xf32>, vector<64x128xf32>, vector<33x128xf32> -> vector<33x128xf32>
    %c0_7 = arith.constant 0 : index
    %c0_8 = arith.constant 0 : index
    %20 = vector.load %arg5[%c0_7, %c0_8] : memref<33x96xf32, #tpu.memory_space<vmem>>, vector<33x96xf32>
    %cst_9 = arith.constant dense<0.000000e+00> : vector<33x128xf32>
    %21 = tpu.matmul %20, %17, %cst_9 {dimension_numbers = #tpu.dot_dimension_numbers<[1], [0], [0], [1], [0, 0, 1, 1], [], []>} : vector<33x96xf32>, vector<96x128xf32>, vector<33x128xf32> -> vector<33x128xf32>
    %22 = arith.mulf %19, %21 : vector<33x128xf32>
    %cst_10 = arith.constant dense<0.000000e+00> : vector<128xf32>
    %23 = vector.multi_reduction <add>, %22, %cst_10 [0] : vector<33x128xf32> to vector<128xf32>
    %24 = vector.shape_cast %23 : vector<128xf32> to vector<1x128xf32>
    %c0_11 = arith.constant 0 : index
    %c0_12 = arith.constant 0 : index
    %25 = vector.load %arg6[%c0_11, %c0_12] : memref<1x128xf32, #tpu.memory_space<vmem>>, vector<1x128xf32>
    tpu.vector_store %arg6[%c0_11, %c0_12], %24 {strides = array<i32>} : memref<1x128xf32, #tpu.memory_space<vmem>>, vector<1x128xf32>,
    return
  }
  func.func @transform_0(%arg0: i32) -> (i32, i32) {
    %c0_i32 = arith.constant 0 : i32
    %c0_i32_0 = arith.constant 0 : i32
    return %c0_i32, %arg0 : i32, i32
  }
  func.func @transform_1(%arg0: i32) -> (i32, i32) {
    %c0_i32 = arith.constant 0 : i32
    %c0_i32_0 = arith.constant 0 : i32
    return %c0_i32, %arg0 : i32, i32
  }
  func.func @transform_2(%arg0: i32) -> (i32, i32) {
    %c0_i32 = arith.constant 0 : i32
    %c0_i32_0 = arith.constant 0 : i32
    return %c0_i32, %arg0 : i32, i32
  }
  func.func @transform_3(%arg0: i32) -> (i32, i32) {
    %c0_i32 = arith.constant 0 : i32
    %c0_i32_0 = arith.constant 0 : i32
    %c0_i32_1 = arith.constant 0 : i32
    return %c0_i32, %c0_i32_0 : i32, i32
  }
  func.func @transform_4(%arg0: i32) -> (i32, i32) {
    %c0_i32 = arith.constant 0 : i32
    %c0_i32_0 = arith.constant 0 : i32
    %c0_i32_1 = arith.constant 0 : i32
    return %c0_i32, %c0_i32_0 : i32, i32
  }
  func.func @transform_5(%arg0: i32) -> (i32, i32) {
    %c0_i32 = arith.constant 0 : i32
    %c0_i32_0 = arith.constant 0 : i32
    return %c0_i32, %arg0 : i32, i32
  }
}

</mosaic_0001>

<bundles_post_ra>
// kernel: _lambda_.1
= control target key start
LH: loop header
LB: loop body
LE: loop exit
PB: predicated region body
PF: predicated region fallthrough
CT: control target
= control target key end

     0   :  { %10 = vsyncpa [#allocation3], 0  ;;  %s1310_s0 = inlined_call_operand.vmem [shape: s32[1,256], index: 0, kind: input, shape index: {}]   ;;  %s1311_s1 = inlined_call_operand.vmem [shape: s32[1,256], index: 1, kind: input, shape index: {}]   ;;  %s1312_s2 = inlined_call_operand.vmem [shape: s32[1,256], index: 2, kind: input, shape index: {}]   ;;  %s1313_s3 = inlined_call_operand.vmem [shape: f32[33,64], index: 3, kind: input, shape index: {}]   ;;  %s1314_s4 = inlined_call_operand.vmem [shape: f32[33,96], index: 4, kind: input, shape index: {}]   ;;  %s1315_s5 = inlined_call_operand.hbm [shape: f32[1,256], index: 5, kind: output, shape index: {}]  }
   0x1   :  { %12 = vsyncpa [#allocation3 + $0x1], 0  ;;  %s1035_s18 = smov 0   ;;  %s1037_s19 = smov 0  }
   0x2   :  { %s1039_s20 = smov 0   ;;  %s1041_s21 = smov 0  }
   0x3 LB: > { %s1056_s22 = sadd.s32 4294967295, %s998_s21   ;;  %s703_s23 = sadd.s32 4294967294, %s998_s21   ;;  %s998_s21 = sphi %s1041_s21, %s1321_s21   ;;  %s994_s20 = sphi %s1039_s20, %s1320_s20   ;;  %s990_s19 = sphi %s1037_s19, %s1319_s19   ;;  %s986_s18 = sphi %s1035_s18, %s1318_s18  }
   0x4   : > { %s1060_s24 = sadd.s32 1, %s998_s21   ;;  %s145_s25 = sadd.s32 1, %s994_s20 }
   0x5   : > { %s142_s26 = ssub.s32 %s998_s21, %s1060_s24  ;;  %p155_p0 = scmp.ne.s32.totalorder %s994_s20, %s990_s19 }
   0x6   : > { %p143_p1 = scmp.eq.s32.totalorder %s142_s26, 0  ;;  %p156_p2 = scmp.eq.s32.totalorder %s1056_s22, 1 }
   0x7   : > { %p161_p3 = scmp.ne.s32.totalorder %s990_s19, %s986_s18  ;;  %p162_p4 = scmp.eq.s32.totalorder %s703_s23, 1 }
   0x8   : > { %s1071_s27 = scalar_select %p143_p1, %s994_s20, %s145_s25  }
   0x9   : > { %p1073_p5 = por %p156_p2, %p155_p0  ;;  %p1077_p6 = por %p162_p4, %p161_p3 }
   0xa   : > { %p706_p7 = scmp.ge.s32.totalorder %s998_s21, 1  ;;  %p204_p8 = scmp.lt.s32.totalorder %s998_s21, 3 }
   0xc   : > { %p205_p9 = pnand %p706_p7, %p204_p8 }
   0xd   : > { %p235_p10 = scmp.lt.s32.totalorder (!%p205_p9), %s1056_s22, 1  ;;  %v247_v0 = vlaneseq (!%p205_p9)  ;;  %v1000_v1 = vmov (!%p205_p9), 0.0|0.0   ;;  %vm1001_vm0 = vmmov (!%p205_p9), 0   ;;  %v1002_v3 = vmov (!%p205_p9), 0.0   ;;  %v380_v57 = vld [vmem:[%s1313_s3] sm:$0xff] (!%p205_p9)  ;;  %v381_v62 = vld [vmem:[%s1313_s3 + $0x8] sm:$0xff] (!%p205_p9) }
   0xe   : > { %208 = sbr.rel (%p205_p9) target bundleno = 314 (0x13a), region = 40  ;;  %875 = vmatprep.subr.bf16.mxu1 (!%p205_p9), %v1000_v1  ;;  %863 = vmatprep.subr.bf16.mxu0 (!%p205_p9), %v1000_v1  ;;  %v1003_v28 = vmov (!%p205_p9), 1.0|1.0   ;;  %v491_v63 = vld [vmem:[%s1314_s4] sm:$0xff] (!%p205_p9)  ;;  %s233_s25 = sand.u32 (!%p205_p9), 1, %s990_s19  }
   0xf   : > { %v1087_v2 = vshrl.u32 (!%p205_p9), %v247_v0, 7  ;;  %809 = vmatprep.mubr.msk.f32.mxu0 (!%p205_p9), %vm1001_vm0, %v1002_v3  ;;  %848 = vmatprep.mubr.msk.f32.mxu1 (!%p205_p9), %vm1001_vm0, %v1002_v3  ;;  %v382_v0 = vld [vmem:[%s1313_s3 + $0x10] sm:$0xff] (!%p205_p9)  ;;  %s760_s26 = sshll.u32 (!%p205_p9), %s1056_s22, 4  ;;  %s621_s10 = scalar_lea.sflag (!%p205_p9), [#allocation3], %s233_s25 }
  0x10   : > { %s1268_s9 = scalar_lea.hbm (!%p205_p9), %s1315_s5, %s760_s26 }
  0x11   : > { %v249_v4 = vadd.s32 (!%p205_p9), 8, %v1087_v2  ;;  %v250_v5 = vadd.s32 (!%p205_p9), 16, %v1087_v2  ;;  %v251_v6 = vadd.s32 (!%p205_p9), 24, %v1087_v2  ;;  %v1103_v7 = vadd.s32 (!%p205_p9), 32, %v1087_v2 }
  0x12   : > { %v1113_v10 = vadd.s32 (!%p205_p9), 40, %v1087_v2  ;;  %v1116_v11 = vadd.s32 (!%p205_p9), 48, %v1087_v2  ;;  %v255_v34 = vadd.s32 (!%p205_p9), 56, %v1087_v2  ;;  %v256_v39 = vadd.s32 (!%p205_p9), 64, %v1087_v2 }
  0x13   : > { %v257_v42 = vadd.s32 (!%p205_p9), 72, %v1087_v2  ;;  %v258_v51 = vadd.s32 (!%p205_p9), 80, %v1087_v2  ;;  %v259_v52 = vadd.s32 (!%p205_p9), 88, %v1087_v2 }
  0x15   : > { %s236_s30 = scalar_select %p235_p10, %s1056_s22, 1 }
  0x16   : > { %s1004_s22 = smov [#allocation2]  }
  0x17   : > { %s240_s8 = scalar_lea.vmem %s1311_s1, %s236_s30  ;;  %s243_s11 = scalar_lea.vmem %s1312_s2, %s236_s30 }
  0x18   : > { %v1105_v8 = vld [vmem:[%s240_s8] ss:$0 sm:$0xff]  ;;  %s237_s14 = scalar_lea.vmem %s1310_s0, %s236_s30  ;;  %s234_s30 = scalar_lea.vmem [#allocation2], %s233_s25 }
  0x19   : > { %v1107_v9 = vld [vmem:[%s243_s11] ss:$0 sm:$0xff]  ;;  %vm292_vm1 = vcmp.eq.s32.totalorder %v1087_v2, %v1105_v8  ;;  %vm293_vm2 = vcmp.eq.s32.totalorder %v249_v4, %v1105_v8  ;;  %vm294_vm5 = vcmp.eq.s32.totalorder %v250_v5, %v1105_v8  ;;  %vm295_vm6 = vcmp.eq.s32.totalorder %v251_v6, %v1105_v8  ;;  %s633_s6 = sshll.u32 %s234_s30, 4  ;;  %s940_s12 = sshll.u32 %s1004_s22, 4  ;;  %s1270_s6 = int_to_ptr.vmem [resolvable:$true] %s633_s6  ;;  %s941_s12 = int_to_ptr.vmem [resolvable:$false] %s940_s12 }
  0x1a   : > { %vm332_vm3 = vcmp.eq.s32.totalorder %v1087_v2, %v1107_v9  ;;  %vm333_vm4 = vcmp.eq.s32.totalorder %v249_v4, %v1107_v9  ;;  %v717_v12 = vsel %vm292_vm1, 1.0, %v1002_v3  ;;  %v718_v13 = vsel %vm293_vm2, 1.0, %v1002_v3  ;;  %v1128_v16 = vld [vmem:[%s237_s14] ss:$0 sm:$0xff]  ;;  %s936_s11 = scalar_lea.vmem %s1270_s6, 16  ;;  %s942_s13 = scalar_lea.vmem %s941_s12, 32 }
  0x1b   : > { %v730_v14 = vsel %vm332_vm3, 1.0, %v1002_v3  ;;  %v731_v15 = vsel %vm333_vm4, 1.0, %v1002_v3  ;;  %v719_v19 = vsel %vm294_vm5, 1.0, %v1002_v3  ;;  %v720_v20 = vsel %vm295_vm6, 1.0, %v1002_v3  ;;  %p937_p11 = scmp.ne.s32.totalorder %s1270_s6, %s936_s11  ;;  %p943_p0 = scmp.lt.s32.totalorder %s1270_s6, %s941_s12 }
  0x1c   : > { %v368_v17 = vsub.f32 %v717_v12, %v730_v14  ;;  %v369_v18 = vsub.f32 %v718_v13, %v731_v15  ;;  %vm334_vm7 = vcmp.eq.s32.totalorder %v250_v5, %v1107_v9  ;;  %vm335_vm8 = vcmp.eq.s32.totalorder %v251_v6, %v1107_v9  ;;  %p944_p1 = scmp.lt.s32.totalorder %s942_s13, %s936_s11 }
  0x1d   : > { %v732_v22 = vsel %vm334_vm7, 1.0, %v1002_v3  ;;  %v733_v23 = vsel %vm335_vm8, 1.0, %v1002_v3  ;;  %vm264_vm9 = vcmp.eq.s32.totalorder %v1087_v2, %v1128_v16  ;;  %vm265_vm10 = vcmp.eq.s32.totalorder %v249_v4, %v1128_v16  ;;  %v383_v2 = vld [vmem:[%s1313_s3 + $0x18] sm:$0xff]  ;;  %v493_v4 = vld [vmem:[%s1314_s4 + $0x10] sm:$0xff]  ;;  %p938_p12 = pnand %p937_p11, %p1073_p5 }
  0x1e   : > { %v876_v21 = vpack.c.bf16 %v369_v18, %v368_v17  ;;  %v370_v24 = vsub.f32 %v719_v19, %v732_v22  ;;  %v371_v25 = vsub.f32 %v720_v20, %v733_v23  ;;  %vm296_vm11 = vcmp.eq.s32.totalorder %v1103_v7, %v1105_v8  ;;  %vm864_vm12 = vmpackc.low %vm265_vm10, %vm264_vm9  ;;  %p945_p2 = por %p944_p1, %p943_p0 }
  0x1f   : > { %vm297_vm13 = vcmp.eq.s32.totalorder %v1113_v10, %v1105_v8  ;;  %v721_v26 = vsel %vm296_vm11, 1.0, %v1002_v3  ;;  %vm336_vm14 = vcmp.eq.s32.totalorder %v1103_v7, %v1107_v9  ;;  %vm337_vm15 = vcmp.eq.s32.totalorder %v1113_v10, %v1107_v9  ;;  %865 = vmatpush3.bf16.msk.msra.mxu0 %vm864_vm12, %v1003_v28  ;;  %p939_p13 = pneg %p938_p12 }
  0x20   : > { %877 = vmatpush3.bf16.msra.mxu1 %v876_v21  ;;  %v879_v27 = vpack.c.bf16 %v371_v25, %v370_v24  ;;  %v722_v29 = vsel %vm297_vm13, 1.0, %v1002_v3  ;;  %v734_v30 = vsel %vm336_vm14, 1.0, %v1002_v3  ;;  %v735_v31 = vsel %vm337_vm15, 1.0, %v1002_v3  ;;  %866 = vmatprep.subr.bf16.mxu0 %v1000_v1 }
  0x21   : > { %878 = vmatprep.subr.bf16.mxu1 %v1000_v1  ;;  %v372_v32 = vsub.f32 %v721_v26, %v734_v30  ;;  %v373_v33 = vsub.f32 %v722_v29, %v735_v31  ;;  %vm266_vm1 = vcmp.eq.s32.totalorder %v250_v5, %v1128_v16  ;;  %vm267_vm2 = vcmp.eq.s32.totalorder %v251_v6, %v1128_v16  ;;  %v384_v5 = vld [vmem:[%s1313_s3 + $0x20] sm:$0x1]  ;;  %v494_v6 = vld [vmem:[%s1314_s4 + $0x18] sm:$0xff]  ;;  %p946_p3 = pnand %p945_p2, %p939_p13 }
  0x22   : > { %vm867_vm3 = vmpackc.low %vm267_vm2, %vm266_vm1  ;;  %vm298_vm4 = vcmp.eq.s32.totalorder %v1116_v11, %v1105_v8  ;;  %vm338_vm5 = vcmp.eq.s32.totalorder %v1116_v11, %v1107_v9  ;;  %vm268_vm6 = vcmp.eq.s32.totalorder %v1103_v7, %v1128_v16  ;;  %vm269_vm7 = vcmp.eq.s32.totalorder %v1113_v10, %v1128_v16  ;;  %v495_v7 = vld [vmem:[%s1314_s4 + $0x20] sm:$0x1] }
  0x23   : > { %v882_v35 = vpack.c.bf16 %v373_v33, %v372_v32  ;;  %v723_v36 = vsel %vm298_vm4, 1.0, %v1002_v3  ;;  %v736_v37 = vsel %vm338_vm5, 1.0, %v1002_v3  ;;  %868 = vmatpush3.bf16.msk.msra.mxu0 %vm867_vm3, %v1003_v28  ;;  %vm299_vm8 = vcmp.eq.s32.totalorder %v255_v34, %v1105_v8  ;;  %vm870_vm10 = vmpackc.low %vm269_vm7, %vm268_vm6 }
  0x24   : > { %880 = vmatpush3.bf16.msra.mxu1 %v879_v27  ;;  %vm339_vm9 = vcmp.eq.s32.totalorder %v255_v34, %v1107_v9  ;;  %v374_v38 = vsub.f32 %v723_v36, %v736_v37  ;;  %v724_v40 = vsel %vm299_vm8, 1.0, %v1002_v3  ;;  %869 = vmatprep.subr.bf16.mxu0 %v1000_v1  ;;  %vm270_vm11 = vcmp.eq.s32.totalorder %v1116_v11, %v1128_v16 }
  0x25   : > { %881 = vmatprep.subr.bf16.mxu1 %v1000_v1  ;;  %v737_v41 = vsel %vm339_vm9, 1.0, %v1002_v3  ;;  %vm300_vm12 = vcmp.eq.s32.totalorder %v256_v39, %v1105_v8  ;;  %vm340_vm13 = vcmp.eq.s32.totalorder %v256_v39, %v1107_v9  ;;  %vm271_vm14 = vcmp.eq.s32.totalorder %v255_v34, %v1128_v16 }
  0x26   : > { %v375_v43 = vsub.f32 %v724_v40, %v737_v41  ;;  %vm301_vm15 = vcmp.eq.s32.totalorder %v257_v42, %v1105_v8  ;;  %v725_v44 = vsel %vm300_vm12, 1.0, %v1002_v3  ;;  %vm341_vm1 = vcmp.eq.s32.totalorder %v257_v42, %v1107_v9  ;;  %vm873_vm2 = vmpackc.low %vm271_vm14, %vm270_vm11 }
  0x27   : > { %v738_v45 = vsel %vm340_vm13, 1.0, %v1002_v3  ;;  %871 = vmatpush3.bf16.msk.msra.mxu0 %vm870_vm10, %v1003_v28  ;;  %v726_v47 = vsel %vm301_vm15, 1.0, %v1002_v3  ;;  %v739_v48 = vsel %vm341_vm1, 1.0, %v1002_v3  ;;  %vm385_vm3 = vcmask 523264  }
  0x28   : > { %883 = vmatpush3.bf16.msra.mxu1 %v882_v35  ;;  %v885_v46 = vpack.c.bf16 %v375_v43, %v374_v38  ;;  %v376_v49 = vsub.f32 %v725_v44, %v738_v45  ;;  %v377_v50 = vsub.f32 %v726_v47, %v739_v48  ;;  %872 = vmatprep.subr.bf16.mxu0 %v1000_v1  ;;  %vm496_vm8 = vcmask 785408  }
  0x29   : > { %884 = vmatprep.subr.bf16.mxu1 %v1000_v1  ;;  %vm302_vm4 = vcmp.eq.s32.totalorder %v258_v51, %v1105_v8  ;;  %vm303_vm5 = vcmp.eq.s32.totalorder %v259_v52, %v1105_v8  ;;  %vm342_vm6 = vcmp.eq.s32.totalorder %v258_v51, %v1107_v9  ;;  %vm343_vm7 = vcmp.eq.s32.totalorder %v259_v52, %v1107_v9 }
  0x2a   : > { %v888_v53 = vpack.c.bf16 %v377_v50, %v376_v49  ;;  %v727_v54 = vsel %vm302_vm4, 1.0, %v1002_v3  ;;  %v728_v55 = vsel %vm303_vm5, 1.0, %v1002_v3  ;;  %v740_v56 = vsel %vm342_vm6, 1.0, %v1002_v3 }
  0x2b   : > { %874 = vmatpush3.bf16.msk.msra.mxu0 %vm873_vm2, %v1003_v28  ;;  %v741_v58 = vsel %vm343_vm7, 1.0, %v1002_v3  ;;  %v378_v59 = vsub.f32 %v727_v54, %v740_v56 }
  0x2c   : > { %886 = vmatpush3.bf16.msra.mxu1 %v885_v46  ;;  %v379_v60 = vsub.f32 %v728_v55, %v741_v58 }
  0x2d   : > { %887 = vmatprep.subr.bf16.mxu1 %v1000_v1 }
  0x2e   : > { %810 = vmatmul.mubr.msk.f32.vlgmr.msra.gmra.mrb[0].mxu0 %vm385_vm3, %v380_v57  ;;  %v891_v61 = vpack.c.bf16 %v379_v60, %v378_v59 }
  0x2f   : > { %812 = vmatprep.mubr.msk.f32.mxu0 %vm1001_vm0, %v1002_v3 }
  0x30   : > { %889 = vmatpush3.bf16.msra.mxu1 %v888_v53 }
  0x31   : > { %890 = vmatprep.subr.bf16.mxu1 %v1000_v1  ;;  %v492_v1 = vld [vmem:[%s1314_s4 + $0x8] sm:$0xff] }
  0x32   : > { %813 = vmatmul.mubr.msk.f32.gmra.mrb[2].mxu0 %vm385_vm3, %v381_v62 }
  0x33   : > { %815 = vmatprep.mubr.msk.f32.mxu0 %vm1001_vm0, %v1002_v3 }
  0x34   : > { %892 = vmatpush3.bf16.msra.mxu1 %v891_v61 }
  0x36   : > { %816 = vmatmul.mubr.msk.f32.gmra.mrb[4].mxu0 %vm385_vm3, %v382_v0 }
  0x37   : > { %849 = vmatmul.mubr.msk.f32.vlgmr.msra.gmra.mrb[0].mxu1 %vm496_vm8, %v491_v63  ;;  %818 = vmatprep.mubr.msk.f32.mxu0 %vm1001_vm0, %v1002_v3 }
  0x38   : > { %851 = vmatprep.mubr.msk.f32.mxu1 %vm1001_vm0, %v1002_v3 }
  0x3a   : > { %819 = vmatmul.mubr.msk.f32.gmra.mrb[6].mxu0 %vm385_vm3, %v383_v2 }
  0x3b   : > { %852 = vmatmul.mubr.msk.f32.gmra.mrb[2].mxu1 %vm496_vm8, %v492_v1  ;;  %821 = vmatprep.mubr.msk.f32.mxu0 %vm1001_vm0, %v1002_v3 }
  0x3c   : > { %854 = vmatprep.mubr.msk.f32.mxu1 %vm1001_vm0, %v1002_v3 }
  0x3e   : > { %822 = vmatmul.mubr.msk.f32.gmra.mrb[8].mxu0 %vm385_vm3, %v384_v5 }
  0x3f   : > { %855 = vmatmul.mubr.msk.f32.gmra.mrb[4].mxu1 %vm496_vm8, %v493_v4 }
  0x40   : > { %857 = vmatprep.mubr.msk.f32.mxu1 %vm1001_vm0, %v1002_v3 }
  0x43   : > { %858 = vmatmul.mubr.msk.f32.gmra.mrb[6].mxu1 %vm496_vm8, %v494_v6 }
  0x44   : > { %860 = vmatprep.mubr.msk.f32.mxu1 %vm1001_vm0, %v1002_v3  ;;  %vm610_vm0 = vcmask 1040384  }
  0x47   : > { %861 = vmatmul.mubr.msk.f32.gmra.mrb[8].mxu1 %vm496_vm8, %v495_v7 }
 0x101   : > { %v467_v8 = vpop.f32.mrb[0].mxu0 }
 0x102   : > { %v811_v9 = vpop.f32.mrb[1].mxu0 }
 0x105   : > { %v472_v10 = vpop.f32.mrb[2].mxu0 }
 0x106   : > { %v814_v11 = vpop.f32.mrb[3].mxu0 }
 0x109   : > { %v477_v15 = vpop.f32.mrb[4].mxu0 }
 0x10a   : > { %v578_v12 = vpop.f32.mrb[0].mxu1  ;;  %v817_v16 = vpop.f32.mrb[5].mxu0 }
 0x10b   : > { %v602_v13 = vmul.f32 %v578_v12, %v467_v8  ;;  %v850_v14 = vpop.f32.mrb[1].mxu1 }
 0x10d   : > { %v482_v20 = vpop.f32.mrb[6].mxu0 }
 0x10e   : > { %v583_v17 = vpop.f32.mrb[2].mxu1  ;;  %v820_v3 = vpop.f32.mrb[7].mxu0 }
 0x10f   : > { %v603_v18 = vmul.f32 %v583_v17, %v472_v10  ;;  %v853_v19 = vpop.f32.mrb[3].mxu1 }
 0x111   : > { %v607_v21 = vadd.f32 %v603_v18, %v602_v13  ;;  %v487_v25 = vpop.f32.mrb[8].mxu0 }
 0x112   : > { %v588_v22 = vpop.f32.mrb[4].mxu1  ;;  %v823_v26 = vpop.f32.mrb[9].mxu0 }
 0x113   : > { %v604_v23 = vmul.f32 %v588_v22, %v477_v15  ;;  %v856_v24 = vpop.f32.mrb[5].mxu1 }
 0x115   : > { %v608_v27 = vadd.f32 %v607_v21, %v604_v23 }
 0x116   : > { %v593_v28 = vpop.f32.mrb[6].mxu1 }
 0x117   : > { %v605_v29 = vmul.f32 %v593_v28, %v482_v20  ;;  %v859_v30 = vpop.f32.mrb[7].mxu1 }
 0x119   : > { %v609_v31 = vadd.f32 %v608_v27, %v605_v29 }
 0x11a   : > { %v598_v32 = vpop.f32.mrb[8].mxu1 }
 0x11b   : > { %v606_v33 = vmul.f32 %v598_v32, %v487_v25  ;;  %v862_v34 = vpop.f32.mrb[9].mxu1 }
 0x11d   : > { %v611_v35 = vsel %vm610_vm0, %v606_v33, 0.0 }
 0x11e   : > { %v612_v36 = vadd.f32 %v611_v35, %v609_v31 }
 0x120   : > { %v613_v37 = vrot.slane %v612_v36, 4 }
 0x122   : > { %v614_v38 = vadd.f32 %v613_v37, %v612_v36 }
 0x124   : > { %v615_v39 = vrot.slane %v614_v38, 2 }
 0x126   : > { %v616_v40 = vadd.f32 %v615_v39, %v614_v38 }
 0x128   : > { %v617_v41 = vrot.slane %v616_v40, 1 }
 0x12a   : > { %v618_v42 = vadd.f32 %v617_v41, %v616_v40 }
 0x12c   : > { %619 = vst [vmem:[%s234_s30] sm:$0x1] %v618_v42 }
 0x12d   : > { %949 = shalt.err (!%p946_p3)
}
 0x12e   : > { %s950_s14 = scalar_lea.hbm %s1268_s9, 16  ;;  %s954_s17 = scalar_lea.hbm %s1315_s5, 32 }
 0x12f   : > { %p951_p4 = scmp.ne.s32.totalorder %s1268_s9, %s950_s14  ;;  %p955_p9 = scmp.lt.u32.totalorder %s1268_s9, %s1315_s5 }
 0x130   : > { %p956_p10 = scmp.lt.u32.totalorder %s954_s17, %s950_s14  ;;  %p958_p12 = scmp.lt.u32.totalorder %s950_s14, %s1268_s9 }
 0x131   : > { %p952_p7 = pnand %p951_p4, %p1073_p5 }
 0x132   : > { %p957_p11 = por %p956_p10, %p955_p9 }
 0x133   : > { %p953_p8 = pneg %p952_p7 }
 0x134   : > { %p959_p13 = por %p958_p12, %p957_p11 }
 0x136   : > { %p960_p0 = pnand %p959_p13, %p953_p8 }
 0x138   : > { %963 = shalt.err (!%p960_p0)
}
 0x139   : > { %893 = dma.vmem_to_hbm [thread:$0]  (%p1073_p5), %s1270_s6, 16, %s1268_s9, %s621_s10  }
 0x13a PF: > { %p899_p1 = scmp.ge.s32.totalorder %s998_s21, 2  ;;  %s645_s26 = sand.u32 1, %s986_s18  }
 0x13b   : > { %s646_s30 = scalar_lea.sflag [#allocation3], %s645_s26 }
 0x13c   : > { %p896_p2 = pnand %p899_p1, %p1077_p6 }
 0x13e   : > { %981 = dma.done.wait (!%p896_p2), %s646_s30, 16  }
 0x13f   : > { %983 = vsyncadd (!%p896_p2), %s646_s30, 4294967280  ;;  %p15_p3 = scmp.ge.s32.totalorder %s1060_s24, 4   ;;  %s1318_s18 = smov %s990_s19 }
 0x140   : > { %s1319_s19 = smov %s994_s20  ;;  %s1320_s20 = smov %s1071_s27 }
 0x141   : > { %s1321_s21 = smov %s1060_s24  ;;  %17 = sbr.rel (!%p15_p3) target bundleno = 3 (0x3), region = 81 }
 0x148   :  { %650 = vsyncpa [#allocation3], 1 }
 0x149   :  { %652 = vsyncpa [#allocation3 + $0x1], 1 }

</bundles_post_ra>
